<compile_context>
chip_gen: v5e
topology: v5e:2x2
jax: 0.10.0
libtpu: 0.0.40
codegen_flags: <defaults>
</compile_context>

<pallas_src>
import jax
import jax.numpy as jnp
from jax import lax
from jax.experimental import pallas as pl
from jax.experimental.pallas import tpu as pltpu

EPS = 1e-5           # InstanceNorm2d default eps
LEAKY_SLOPE = 0.3


def _round_up(v, m):
    return ((v + m - 1) // m) * m


def _make_kernel(*, s, kh, kw, Wq, OH, OW, N):
    """Build the fused conv + instance-norm + leaky-ReLU kernel (constants closed over)."""
    inv_p = 1.0 / float(OH * OW)

    # Group the kh*kw kernel offsets by their stride phase so each phase plane is
    # loaded from VMEM once and reused for all offsets that map to it.
    offsets_by_phase = {}
    for i in range(kh):
        for j in range(kw):
            offsets_by_phase.setdefault((i % s, j % s), []).append((i, j))

    def kernel(xs_ref, w_ref, gb_ref, mask_ref, o_ref):
        # xs_ref:   (s, s, Cin_p, Lpad) bf16  -- stride-phase planes of x (flattened Hq*Wq + pad)
        # w_ref:    (kh*kw, Cout, Cin_p) bf16 -- per-offset 1x1 weight matrices
        # gb_ref:   (Cout, 2) f32             -- [gamma, beta]
        # mask_ref: (1, N) f32                -- 1.0 on valid output positions, else 0.0
        # o_ref:    (Cout, N) bf16
        acc = jnp.zeros(o_ref.shape, jnp.float32)

        # Fused "im2col": each offset is a contiguous static lane slice of a phase plane.
        for (pi, pj), offs in offsets_by_phase.items():
            plane = xs_ref[pi, pj]                      # (Cin_p, Lpad) bf16
            for (i, j) in offs:
                t = i * kw + j
                shift = (i // s) * Wq + (j // s)
                rhs = plane[:, shift:shift + N]         # (Cin_p, N) bf16
                acc = acc + jnp.dot(w_ref[t], rhs,
                                    preferred_element_type=jnp.float32)

        # Instance-norm statistics over the valid spatial positions only.
        mask = mask_ref[...]                            # (1, N) f32
        ym = acc * mask
        s1 = jnp.sum(ym, axis=1, keepdims=True)         # (Cout, 1)
        s2 = jnp.sum(ym * ym, axis=1, keepdims=True)    # (Cout, 1)
        mean = s1 * inv_p
        var = jnp.maximum(s2 * inv_p - mean * mean, 0.0)
        inv_std = lax.rsqrt(var + EPS)

        gamma = gb_ref[:, 0:1]                          # (Cout, 1)
        beta = gb_ref[:, 1:2]                           # (Cout, 1)
        scale = gamma * inv_std                         # fold norm + affine
        offset = beta - mean * scale
        z = acc * scale + offset                        # (Cout, N) f32

        o_ref[...] = jnp.where(z >= 0, z, LEAKY_SLOPE * z).astype(o_ref.dtype)

    return kernel


def encoder_block(x, conv_w, conv_b, gamma, beta, *, stride):
    """x: (B, Cin, H, W) NCHW.  conv_w: (Cout, Cin, kh, kw).  Returns (B, Cout, OH, OW) bf16.

    conv_b is accepted for interface fidelity but intentionally not applied: a
    per-channel constant added before InstanceNorm is exactly cancelled by the
    per-instance mean subtraction (the reference check below includes the bias
    and matches).
    """
    del conv_b  # mathematically a no-op under InstanceNorm
    assert isinstance(stride, int) and stride >= 1
    B, Cin, H, W = x.shape
    Cout, _, kh, kw = conv_w.shape
    s = stride
    OH = (H - kh) // s + 1
    OW = (W - kw) // s + 1
    assert OH > 0 and OW > 0

    # Stride-phase split (space-to-depth): xs[b, pi, pj, ci, r*Wq + c] = x[b, ci, r*s+pi, c*s+pj].
    Hp, Wp = _round_up(H, s), _round_up(W, s)
    Hq, Wq = Hp // s, Wp // s
    Cin_p = max(8, _round_up(Cin, 8))                  # clean sublane tiling for the matmul RHS
    T = kh * kw

    N = _round_up(OH * Wq, 128)                        # lane-dense output width (padded)
    max_shift = ((kh - 1) // s) * Wq + (kw - 1) // s
    Lpad = _round_up(max(Hq * Wq, N + max_shift), 128)

    xb = x.astype(jnp.bfloat16)
    xb = jnp.pad(xb, ((0, 0), (0, Cin_p - Cin), (0, Hp - H), (0, Wp - W)))
    xs = xb.reshape(B, Cin_p, Hq, s, Wq, s)
    xs = xs.transpose(0, 3, 5, 1, 2, 4)                # (B, s, s, Cin_p, Hq, Wq)
    xs = xs.reshape(B, s, s, Cin_p, Hq * Wq)
    xs = jnp.pad(xs, ((0, 0), (0, 0), (0, 0), (0, 0), (0, Lpad - Hq * Wq)))

    # Per-offset (Cout, Cin) weight matrices, t = i*kw + j; bf16 MXU operands.
    w_r = conv_w.astype(jnp.bfloat16).transpose(2, 3, 0, 1).reshape(T, Cout, Cin)
    w_r = jnp.pad(w_r, ((0, 0), (0, 0), (0, Cin_p - Cin)))

    gb = jnp.stack([gamma, beta], axis=1).astype(jnp.float32)          # (Cout, 2)

    # Validity mask over the padded flattened spatial axis (stats use true OH*OW).
    cols = jnp.arange(N, dtype=jnp.int32)
    valid = ((cols // Wq) < OH) & ((cols % Wq) < OW)
    mask = valid.astype(jnp.float32).reshape(1, N)

    kernel = _make_kernel(s=s, kh=kh, kw=kw, Wq=Wq, OH=OH, OW=OW, N=N)

    # Explicit VMEM budget sized to the (double-buffered) blocks, with headroom,
    # capped well under v7x's 64 MiB physical VMEM.
    block_bytes = 2 * (s * s * Cin_p * Lpad * 2 + T * Cout * Cin_p * 2
                       + Cout * 2 * 4 + N * 4 + Cout * N * 2)
    vmem_limit = int(min(max(2 * block_bytes + (8 << 20), 32 << 20), 48 << 20))

    out = pl.pallas_call(
        kernel,
        out_shape=jax.ShapeDtypeStruct((B, Cout, N), jnp.bfloat16),
        grid_spec=pltpu.PrefetchScalarGridSpec(
            num_scalar_prefetch=0,
            grid=(B,),
            in_specs=[
                pl.BlockSpec((None, s, s, Cin_p, Lpad), lambda b: (b, 0, 0, 0, 0)),
                pl.BlockSpec((T, Cout, Cin_p), lambda b: (0, 0, 0)),
                pl.BlockSpec((Cout, 2), lambda b: (0, 0)),
                pl.BlockSpec((1, N), lambda b: (0, 0)),
            ],
            out_specs=pl.BlockSpec((None, Cout, N), lambda b: (b, 0, 0)),
        ),
        compiler_params=pltpu.CompilerParams(
            dimension_semantics=("parallel",),
            vmem_limit_bytes=vmem_limit),
    )(xs, w_r, gb, mask)                               # (B, Cout, N)

    # Drop padded columns: p = oh*Wq + ow, keep ow < OW.  Pure XLA slicing/reshape.
    y = out[:, :, :OH * Wq].reshape(B, Cout, OH, Wq)[:, :, :, :OW]
    return y                                           # bf16 (B, Cout, OH, OW)


def _reference(x, conv_w, conv_b, gamma, beta, *, stride, matmul_dtype=jnp.float32):
    """Pure-JAX reference matching PyTorch semantics (bias included).

    matmul_dtype=bf16 mirrors the kernel's bf16 matmul operands (f32 accumulation)
    for a tight-tolerance comparison; f32 gives the PyTorch-style reference.
    """
    y = lax.conv_general_dilated(
        x.astype(matmul_dtype), conv_w.astype(matmul_dtype),
        window_strides=(stride, stride), padding="VALID",
        dimension_numbers=("NCHW", "OIHW", "NCHW"),
        preferred_element_type=jnp.float32)
    y = y + conv_b.reshape(1, -1, 1, 1)
    mean = jnp.mean(y, axis=(2, 3), keepdims=True)
    var = jnp.mean((y - mean) ** 2, axis=(2, 3), keepdims=True)
    yn = (y - mean) * lax.rsqrt(var + EPS)
    z = yn * gamma.reshape(1, -1, 1, 1) + beta.reshape(1, -1, 1, 1)
    return jnp.where(z >= 0, z, LEAKY_SLOPE * z)


if __name__ == "__main__":
    # Small shapes consistent with the module.
    B, Cin, H, W = 2, 4, 16, 16
    Cout, ksize, stride = 8, 3, 2

    key = jax.random.PRNGKey(0)
    kx, kw_, kb = jax.random.split(key, 3)

    x = jax.random.normal(kx, (B, Cin, H, W), dtype=jnp.float32)
    fan_in = Cin * ksize * ksize
    conv_w = jax.random.normal(kw_, (Cout, Cin, ksize, ksize), dtype=jnp.float32) / jnp.sqrt(fan_in)
    conv_b = jax.random.normal(kb, (Cout,), dtype=jnp.float32) * 0.1
    gamma = jnp.ones((Cout,), dtype=jnp.float32)     # InstanceNorm2d affine init
    beta = jnp.zeros((Cout,), dtype=jnp.float32)

    out = encoder_block(x, conv_w, conv_b, gamma, beta, stride=stride)
    out = jax.block_until_ready(out)
    out_f32 = out.astype(jnp.float32)

    # Tight check against a reference using the same bf16 conv operands (bias included
    # in the reference -- it cancels under InstanceNorm, which the kernel exploits).
    ref_matched = _reference(x, conv_w, conv_b, gamma, beta, stride=stride,
                             matmul_dtype=jnp.bfloat16)
    # Loose sanity check against the full-f32 PyTorch-style reference.
    ref_f32 = _reference(x, conv_w, conv_b, gamma, beta, stride=stride,
                         matmul_dtype=jnp.float32)

    assert out.shape == ref_f32.shape, (out.shape, ref_f32.shape)
    assert out.dtype == jnp.bfloat16
    assert jnp.allclose(out_f32, ref_matched, rtol=3e-2, atol=3e-2), \
        "mismatch vs bf16-matched reference"
    assert jnp.allclose(out_f32, ref_f32, rtol=1e-1, atol=1e-1), \
        "mismatch vs f32 reference (sanity)"

    print("KERNEL_OK")
</pallas_src>

<mosaic_0001>
module attributes {stable_mosaic.version = 11 : i64} {
  func.func @kernel(%arg0: i32, %arg1: memref<1x2x2x8x256xbf16, #tpu.memory_space<vmem>>, %arg2: memref<9x8x8xbf16, #tpu.memory_space<vmem>>, %arg3: memref<8x2xf32, #tpu.memory_space<vmem>>, %arg4: memref<1x128xf32, #tpu.memory_space<vmem>>, %arg5: memref<1x8x128xbf16, #tpu.memory_space<vmem>>) attributes {dimension_semantics = [#tpu.dimension_semantics<parallel>], iteration_bounds = array<i64: 2>, scalar_prefetch = 0 : i64, scratch_operands = 0 : i64, tpu.core_type = #tpu.core_type<tc>, window_params = [{transform_indices = @transform_0, window_bounds = array<i64: 1, 2, 2, 8, 256>}, {pipeline_mode = #tpu.pipeline_mode<synchronous>, transform_indices = @transform_1, window_bounds = array<i64: 9, 8, 8>}, {pipeline_mode = #tpu.pipeline_mode<synchronous>, transform_indices = @transform_2, window_bounds = array<i64: 8, 2>}, {pipeline_mode = #tpu.pipeline_mode<synchronous>, transform_indices = @transform_3, window_bounds = array<i64: 1, 128>}, {transform_indices = @transform_4, window_bounds = array<i64: 1, 8, 128>}]} {
    %cst = arith.constant 0.000000e+00 : f32
    %0 = vector.broadcast %cst : f32 to vector<8x128xf32>
    %c0 = arith.constant 0 : index
    %c0_0 = arith.constant 0 : index
    %c0_1 = arith.constant 0 : index
    %c0_2 = arith.constant 0 : index
    %c0_3 = arith.constant 0 : index
    %1 = vector.load %arg1[%c0, %c0_0, %c0_1, %c0_2, %c0_3] : memref<1x2x2x8x256xbf16, #tpu.memory_space<vmem>>, vector<1x1x1x8x256xbf16>
    %2 = vector.shape_cast %1 : vector<1x1x1x8x256xbf16> to vector<8x256xbf16>
    %3 = vector.extract_strided_slice %2 {offsets = [0, 0], sizes = [8, 128], strides = [1, 1]} : vector<8x256xbf16> to vector<8x128xbf16>
    %c0_4 = arith.constant 0 : index
    %c0_5 = arith.constant 0 : index
    %c0_6 = arith.constant 0 : index
    %4 = vector.load %arg2[%c0_4, %c0_5, %c0_6] : memref<9x8x8xbf16, #tpu.memory_space<vmem>>, vector<1x8x8xbf16>
    %5 = vector.shape_cast %4 : vector<1x8x8xbf16> to vector<8x8xbf16>
    %cst_7 = arith.constant dense<0.000000e+00> : vector<8x128xf32>
    %6 = tpu.matmul %5, %3, %cst_7 {dimension_numbers = #tpu.dot_dimension_numbers<[1], [0], [0], [1], [0, 0, 1, 1], [], []>} : vector<8x8xbf16>, vector<8x128xbf16>, vector<8x128xf32> -> vector<8x128xf32>
    %7 = arith.addf %0, %6 : vector<8x128xf32>
    %8 = vector.extract_strided_slice %2 {offsets = [0, 1], sizes = [8, 128], strides = [1, 1]} : vector<8x256xbf16> to vector<8x128xbf16>
    %c2 = arith.constant 2 : index
    %c0_8 = arith.constant 0 : index
    %c0_9 = arith.constant 0 : index
    %9 = vector.load %arg2[%c2, %c0_8, %c0_9] : memref<9x8x8xbf16, #tpu.memory_space<vmem>>, vector<1x8x8xbf16>
    %10 = vector.shape_cast %9 : vector<1x8x8xbf16> to vector<8x8xbf16>
    %cst_10 = arith.constant dense<0.000000e+00> : vector<8x128xf32>
    %11 = tpu.matmul %10, %8, %cst_10 {dimension_numbers = #tpu.dot_dimension_numbers<[1], [0], [0], [1], [0, 0, 1, 1], [], []>} : vector<8x8xbf16>, vector<8x128xbf16>, vector<8x128xf32> -> vector<8x128xf32>
    %12 = arith.addf %7, %11 : vector<8x128xf32>
    %13 = vector.extract_strided_slice %2 {offsets = [0, 8], sizes = [8, 128], strides = [1, 1]} : vector<8x256xbf16> to vector<8x128xbf16>
    %c6 = arith.constant 6 : index
    %c0_11 = arith.constant 0 : index
    %c0_12 = arith.constant 0 : index
    %14 = vector.load %arg2[%c6, %c0_11, %c0_12] : memref<9x8x8xbf16, #tpu.memory_space<vmem>>, vector<1x8x8xbf16>
    %15 = vector.shape_cast %14 : vector<1x8x8xbf16> to vector<8x8xbf16>
    %cst_13 = arith.constant dense<0.000000e+00> : vector<8x128xf32>
    %16 = tpu.matmul %15, %13, %cst_13 {dimension_numbers = #tpu.dot_dimension_numbers<[1], [0], [0], [1], [0, 0, 1, 1], [], []>} : vector<8x8xbf16>, vector<8x128xbf16>, vector<8x128xf32> -> vector<8x128xf32>
    %17 = arith.addf %12, %16 : vector<8x128xf32>
    %18 = vector.extract_strided_slice %2 {offsets = [0, 9], sizes = [8, 128], strides = [1, 1]} : vector<8x256xbf16> to vector<8x128xbf16>
    %c8 = arith.constant 8 : index
    %c0_14 = arith.constant 0 : index
    %c0_15 = arith.constant 0 : index
    %19 = vector.load %arg2[%c8, %c0_14, %c0_15] : memref<9x8x8xbf16, #tpu.memory_space<vmem>>, vector<1x8x8xbf16>
    %20 = vector.shape_cast %19 : vector<1x8x8xbf16> to vector<8x8xbf16>
    %cst_16 = arith.constant dense<0.000000e+00> : vector<8x128xf32>
    %21 = tpu.matmul %20, %18, %cst_16 {dimension_numbers = #tpu.dot_dimension_numbers<[1], [0], [0], [1], [0, 0, 1, 1], [], []>} : vector<8x8xbf16>, vector<8x128xbf16>, vector<8x128xf32> -> vector<8x128xf32>
    %22 = arith.addf %17, %21 : vector<8x128xf32>
    %c0_17 = arith.constant 0 : index
    %c0_18 = arith.constant 0 : index
    %c1 = arith.constant 1 : index
    %c0_19 = arith.constant 0 : index
    %c0_20 = arith.constant 0 : index
    %23 = vector.load %arg1[%c0_17, %c0_18, %c1, %c0_19, %c0_20] : memref<1x2x2x8x256xbf16, #tpu.memory_space<vmem>>, vector<1x1x1x8x256xbf16>
    %24 = vector.shape_cast %23 : vector<1x1x1x8x256xbf16> to vector<8x256xbf16>
    %25 = vector.extract_strided_slice %24 {offsets = [0, 0], sizes = [8, 128], strides = [1, 1]} : vector<8x256xbf16> to vector<8x128xbf16>
    %c1_21 = arith.constant 1 : index
    %c0_22 = arith.constant 0 : index
    %c0_23 = arith.constant 0 : index
    %26 = vector.load %arg2[%c1_21, %c0_22, %c0_23] : memref<9x8x8xbf16, #tpu.memory_space<vmem>>, vector<1x8x8xbf16>
    %27 = vector.shape_cast %26 : vector<1x8x8xbf16> to vector<8x8xbf16>
    %cst_24 = arith.constant dense<0.000000e+00> : vector<8x128xf32>
    %28 = tpu.matmul %27, %25, %cst_24 {dimension_numbers = #tpu.dot_dimension_numbers<[1], [0], [0], [1], [0, 0, 1, 1], [], []>} : vector<8x8xbf16>, vector<8x128xbf16>, vector<8x128xf32> -> vector<8x128xf32>
    %29 = arith.addf %22, %28 : vector<8x128xf32>
    %30 = vector.extract_strided_slice %24 {offsets = [0, 8], sizes = [8, 128], strides = [1, 1]} : vector<8x256xbf16> to vector<8x128xbf16>
    %c7 = arith.constant 7 : index
    %c0_25 = arith.constant 0 : index
    %c0_26 = arith.constant 0 : index
    %31 = vector.load %arg2[%c7, %c0_25, %c0_26] : memref<9x8x8xbf16, #tpu.memory_space<vmem>>, vector<1x8x8xbf16>
    %32 = vector.shape_cast %31 : vector<1x8x8xbf16> to vector<8x8xbf16>
    %cst_27 = arith.constant dense<0.000000e+00> : vector<8x128xf32>
    %33 = tpu.matmul %32, %30, %cst_27 {dimension_numbers = #tpu.dot_dimension_numbers<[1], [0], [0], [1], [0, 0, 1, 1], [], []>} : vector<8x8xbf16>, vector<8x128xbf16>, vector<8x128xf32> -> vector<8x128xf32>
    %34 = arith.addf %29, %33 : vector<8x128xf32>
    %c0_28 = arith.constant 0 : index
    %c1_29 = arith.constant 1 : index
    %c0_30 = arith.constant 0 : index
    %c0_31 = arith.constant 0 : index
    %c0_32 = arith.constant 0 : index
    %35 = vector.load %arg1[%c0_28, %c1_29, %c0_30, %c0_31, %c0_32] : memref<1x2x2x8x256xbf16, #tpu.memory_space<vmem>>, vector<1x1x1x8x256xbf16>
    %36 = vector.shape_cast %35 : vector<1x1x1x8x256xbf16> to vector<8x256xbf16>
    %37 = vector.extract_strided_slice %36 {offsets = [0, 0], sizes = [8, 128], strides = [1, 1]} : vector<8x256xbf16> to vector<8x128xbf16>
    %c3 = arith.constant 3 : index
    %c0_33 = arith.constant 0 : index
    %c0_34 = arith.constant 0 : index
    %38 = vector.load %arg2[%c3, %c0_33, %c0_34] : memref<9x8x8xbf16, #tpu.memory_space<vmem>>, vector<1x8x8xbf16>
    %39 = vector.shape_cast %38 : vector<1x8x8xbf16> to vector<8x8xbf16>
    %cst_35 = arith.constant dense<0.000000e+00> : vector<8x128xf32>
    %40 = tpu.matmul %39, %37, %cst_35 {dimension_numbers = #tpu.dot_dimension_numbers<[1], [0], [0], [1], [0, 0, 1, 1], [], []>} : vector<8x8xbf16>, vector<8x128xbf16>, vector<8x128xf32> -> vector<8x128xf32>
    %41 = arith.addf %34, %40 : vector<8x128xf32>
    %42 = vector.extract_strided_slice %36 {offsets = [0, 1], sizes = [8, 128], strides = [1, 1]} : vector<8x256xbf16> to vector<8x128xbf16>
    %c5 = arith.constant 5 : index
    %c0_36 = arith.constant 0 : index
    %c0_37 = arith.constant 0 : index
    %43 = vector.load %arg2[%c5, %c0_36, %c0_37] : memref<9x8x8xbf16, #tpu.memory_space<vmem>>, vector<1x8x8xbf16>
    %44 = vector.shape_cast %43 : vector<1x8x8xbf16> to vector<8x8xbf16>
    %cst_38 = arith.constant dense<0.000000e+00> : vector<8x128xf32>
    %45 = tpu.matmul %44, %42, %cst_38 {dimension_numbers = #tpu.dot_dimension_numbers<[1], [0], [0], [1], [0, 0, 1, 1], [], []>} : vector<8x8xbf16>, vector<8x128xbf16>, vector<8x128xf32> -> vector<8x128xf32>
    %46 = arith.addf %41, %45 : vector<8x128xf32>
    %c0_39 = arith.constant 0 : index
    %c1_40 = arith.constant 1 : index
    %c1_41 = arith.constant 1 : index
    %c0_42 = arith.constant 0 : index
    %c0_43 = arith.constant 0 : index
    %47 = vector.load %arg1[%c0_39, %c1_40, %c1_41, %c0_42, %c0_43] : memref<1x2x2x8x256xbf16, #tpu.memory_space<vmem>>, vector<1x1x1x8x256xbf16>
    %48 = vector.shape_cast %47 : vector<1x1x1x8x256xbf16> to vector<8x256xbf16>
    %49 = vector.extract_strided_slice %48 {offsets = [0, 0], sizes = [8, 128], strides = [1, 1]} : vector<8x256xbf16> to vector<8x128xbf16>
    %c4 = arith.constant 4 : index
    %c0_44 = arith.constant 0 : index
    %c0_45 = arith.constant 0 : index
    %50 = vector.load %arg2[%c4, %c0_44, %c0_45] : memref<9x8x8xbf16, #tpu.memory_space<vmem>>, vector<1x8x8xbf16>
    %51 = vector.shape_cast %50 : vector<1x8x8xbf16> to vector<8x8xbf16>
    %cst_46 = arith.constant dense<0.000000e+00> : vector<8x128xf32>
    %52 = tpu.matmul %51, %49, %cst_46 {dimension_numbers = #tpu.dot_dimension_numbers<[1], [0], [0], [1], [0, 0, 1, 1], [], []>} : vector<8x8xbf16>, vector<8x128xbf16>, vector<8x128xf32> -> vector<8x128xf32>
    %53 = arith.addf %46, %52 : vector<8x128xf32>
    %c0_47 = arith.constant 0 : index
    %c0_48 = arith.constant 0 : index
    %54 = vector.load %arg4[%c0_47, %c0_48] : memref<1x128xf32, #tpu.memory_space<vmem>>, vector<1x128xf32>
    %55 = vector.broadcast %54 : vector<1x128xf32> to vector<8x128xf32>
    %56 = arith.mulf %53, %55 : vector<8x128xf32>
    %cst_49 = arith.constant dense<0.000000e+00> : vector<8xf32>
    %57 = vector.multi_reduction <add>, %56, %cst_49 [1] : vector<8x128xf32> to vector<8xf32>
    %58 = vector.shape_cast %57 : vector<8xf32> to vector<8x1xf32>
    %59 = arith.mulf %56, %56 : vector<8x128xf32>
    %cst_50 = arith.constant dense<0.000000e+00> : vector<8xf32>
    %60 = vector.multi_reduction <add>, %59, %cst_50 [1] : vector<8x128xf32> to vector<8xf32>
    %61 = vector.shape_cast %60 : vector<8xf32> to vector<8x1xf32>
    %cst_51 = arith.constant 0.0204081628 : f32
    %62 = vector.broadcast %cst_51 : f32 to vector<8x1xf32>
    %63 = arith.mulf %58, %62 : vector<8x1xf32>
    %cst_52 = arith.constant 0.0204081628 : f32
    %64 = vector.broadcast %cst_52 : f32 to vector<8x1xf32>
    %65 = arith.mulf %61, %64 : vector<8x1xf32>
    %66 = arith.mulf %63, %63 : vector<8x1xf32>
    %67 = arith.subf %65, %66 : vector<8x1xf32>
    %cst_53 = arith.constant 0.000000e+00 : f32
    %68 = vector.broadcast %cst_53 : f32 to vector<8x1xf32>
    %69 = arith.maximumf %67, %68 : vector<8x1xf32>
    %cst_54 = arith.constant 9.99999974E-6 : f32
    %70 = vector.broadcast %cst_54 : f32 to vector<8x1xf32>
    %71 = arith.addf %69, %70 : vector<8x1xf32>
    %72 = math.rsqrt %71 : vector<8x1xf32>
    %c0_55 = arith.constant 0 : index
    %c0_56 = arith.constant 0 : index
    %73 = vector.load %arg3[%c0_55, %c0_56] : memref<8x2xf32, #tpu.memory_space<vmem>>, vector<8x1xf32>
    %c0_57 = arith.constant 0 : index
    %c1_58 = arith.constant 1 : index
    %74 = vector.load %arg3[%c0_57, %c1_58] : memref<8x2xf32, #tpu.memory_space<vmem>>, vector<8x1xf32>
    %75 = arith.mulf %73, %72 : vector<8x1xf32>
    %76 = arith.mulf %63, %75 : vector<8x1xf32>
    %77 = arith.subf %74, %76 : vector<8x1xf32>
    %78 = vector.broadcast %75 : vector<8x1xf32> to vector<8x128xf32>
    %79 = arith.mulf %53, %78 : vector<8x128xf32>
    %80 = vector.broadcast %77 : vector<8x1xf32> to vector<8x128xf32>
    %81 = arith.addf %79, %80 : vector<8x128xf32>
    %cst_59 = arith.constant 0.000000e+00 : f32
    %82 = vector.broadcast %cst_59 : f32 to vector<8x128xf32>
    %83 = arith.cmpf oge, %81, %82 : vector<8x128xf32>
    %cst_60 = arith.constant 3.000000e-01 : f32
    %84 = vector.broadcast %cst_60 : f32 to vector<8x128xf32>
    %85 = arith.mulf %84, %81 : vector<8x128xf32>
    %86 = arith.select %83, %81, %85 : vector<8x128xi1>, vector<8x128xf32>
    %87 = arith.truncf %86 : vector<8x128xf32> to vector<8x128xbf16>
    %c0_61 = arith.constant 0 : index
    %c0_62 = arith.constant 0 : index
    %c0_63 = arith.constant 0 : index
    %88 = vector.load %arg5[%c0_61, %c0_62, %c0_63] : memref<1x8x128xbf16, #tpu.memory_space<vmem>>, vector<1x8x128xbf16>
    %89 = vector.shape_cast %88 : vector<1x8x128xbf16> to vector<8x128xbf16>
    %90 = vector.shape_cast %87 : vector<8x128xbf16> to vector<1x8x128xbf16>
    tpu.vector_store %arg5[%c0_61, %c0_62, %c0_63], %90 {strides = array<i32>} : memref<1x8x128xbf16, #tpu.memory_space<vmem>>, vector<1x8x128xbf16>,
    return
  }
  func.func @transform_0(%arg0: i32) -> (i32, i32, i32, i32, i32) {
    %c0_i32 = arith.constant 0 : i32
    %c0_i32_0 = arith.constant 0 : i32
    %c0_i32_1 = arith.constant 0 : i32
    %c0_i32_2 = arith.constant 0 : i32
    %c0_i32_3 = arith.constant 0 : i32
    return %arg0, %c0_i32, %c0_i32_0, %c0_i32_1, %c0_i32_2 : i32, i32, i32, i32, i32
  }
  func.func @transform_1(%arg0: i32) -> (i32, i32, i32) {
    %c0_i32 = arith.constant 0 : i32
    %c0_i32_0 = arith.constant 0 : i32
    %c0_i32_1 = arith.constant 0 : i32
    %c0_i32_2 = arith.constant 0 : i32
    return %c0_i32, %c0_i32_0, %c0_i32_1 : i32, i32, i32
  }
  func.func @transform_2(%arg0: i32) -> (i32, i32) {
    %c0_i32 = arith.constant 0 : i32
    %c0_i32_0 = arith.constant 0 : i32
    %c0_i32_1 = arith.constant 0 : i32
    return %c0_i32, %c0_i32_0 : i32, i32
  }
  func.func @transform_3(%arg0: i32) -> (i32, i32) {
    %c0_i32 = arith.constant 0 : i32
    %c0_i32_0 = arith.constant 0 : i32
    %c0_i32_1 = arith.constant 0 : i32
    return %c0_i32, %c0_i32_0 : i32, i32
  }
  func.func @transform_4(%arg0: i32) -> (i32, i32, i32) {
    %c0_i32 = arith.constant 0 : i32
    %c0_i32_0 = arith.constant 0 : i32
    %c0_i32_1 = arith.constant 0 : i32
    return %arg0, %c0_i32, %c0_i32_0 : i32, i32, i32
  }
}

</mosaic_0001>

<bundles_post_ra>
// kernel: tpu_custom_call.1
= control target key start
LH: loop header
LB: loop body
LE: loop exit
PB: predicated region body
PF: predicated region fallthrough
CT: control target
= control target key end

     0   :  { %9 = vsyncpa [#allocation3], 0  ;;  %s893_s0 = inlined_call_operand.vmem [shape: bf16[2,2,2,8,256], index: 0, kind: input, shape index: {}]   ;;  %s894_s1 = inlined_call_operand.vmem [shape: bf16[9,8,8], index: 1, kind: input, shape index: {}]   ;;  %s895_s2 = inlined_call_operand.vmem [shape: f32[8,2], index: 2, kind: input, shape index: {}]   ;;  %s896_s3 = inlined_call_operand.vmem [shape: f32[1,128], index: 3, kind: input, shape index: {}]   ;;  %s897_s4 = inlined_call_operand.hbm [shape: bf16[2,8,128], index: 4, kind: output, shape index: {}]  }
   0x1   :  { %11 = vsyncpa [#allocation3 + $0x1], 0  ;;  %s747_s15 = smov 0   ;;  %s749_s16 = smov 0  }
   0x2   :  { %s751_s17 = smov 0   ;;  %s753_s18 = smov 0  }
   0x3 LB: > { %s768_s19 = sadd.s32 4294967295, %s714_s18   ;;  %s570_s20 = sadd.s32 4294967294, %s714_s18   ;;  %s714_s18 = sphi %s753_s18, %s903_s18   ;;  %s710_s17 = sphi %s751_s17, %s902_s17   ;;  %s706_s16 = sphi %s749_s16, %s901_s16   ;;  %s702_s15 = sphi %s747_s15, %s900_s15  }
   0x4   : > { %s772_s21 = sadd.s32 1, %s714_s18   ;;  %s113_s22 = sadd.s32 1, %s710_s17 }
   0x5   : > { %s110_s23 = ssub.s32 %s714_s18, %s772_s21  ;;  %p123_p0 = scmp.ne.s32.totalorder %s710_s17, %s706_s16 }
   0x6   : > { %p111_p1 = scmp.eq.s32.totalorder %s110_s23, 0  ;;  %p124_p2 = scmp.eq.s32.totalorder %s768_s19, 1 }
   0x7   : > { %p129_p3 = scmp.ne.s32.totalorder %s706_s16, %s702_s15  ;;  %p130_p4 = scmp.eq.s32.totalorder %s570_s20, 1 }
   0x8   : > { %s783_s24 = scalar_select %p111_p1, %s710_s17, %s113_s22  }
   0x9   : > { %p785_p5 = por %p124_p2, %p123_p0  ;;  %p789_p6 = por %p130_p4, %p129_p3 }
   0xa   : > { %p573_p7 = scmp.ge.s32.totalorder %s714_s18, 1  ;;  %p165_p8 = scmp.lt.s32.totalorder %s714_s18, 3 }
   0xc   : > { %p166_p9 = pnand %p573_p7, %p165_p8 }
   0xd   : > { %p191_p10 = scmp.lt.s32.totalorder (!%p166_p9), %s768_s19, 1  ;;  %s716_s6 = smov (!%p166_p9), 120  }
   0xe   : > { %169 = sbr.rel (%p166_p9) target bundleno = 708 (0x2c4), region = 36  ;;  %s717_s7 = smov (!%p166_p9), 127  }
   0xf   : > { %s718_s8 = smov (!%p166_p9), 119   ;;  %s720_s14 = smov (!%p166_p9), 1  }
  0x10   : > { %s188_s20 = sand.u32 (!%p166_p9), 1, %s706_s16   ;;  %s598_s23 = sshll.u32 (!%p166_p9), %s768_s19, 2 }
  0x11   : > { %s574_s22 = sshll.u32 (!%p166_p9), %s188_s20, 2  ;;  %s506_s29 = scalar_lea.hbm (!%p166_p9), %s897_s4, %s598_s23 }
  0x12   : > { %s190_s30 = scalar_lea.vmem (!%p166_p9), [#allocation2], %s574_s22  ;;  %s672_s11 = scalar_lea.hbm (!%p166_p9), %s897_s4, 8 }
  0x13   : > { %s192_s27 = scalar_select %p191_p10, %s768_s19, 1  ;;  %vm216_vm0 = vcmask 1043456   ;;  %vm212_vm1 = vcmask 64512   ;;  %v198_v17 = vld [vmem:[%s894_s1] sm:$0xf]  ;;  %vm286_vm2 = vcmask 973824  }
  0x14   : > { %v582_v21 = vld [vmem:[%s894_s1 + $0x20] sm:$0xf]  ;;  %vm210_vm3 = vcmask 1039360   ;;  %vm258_vm4 = vcmask 982016   ;;  %v577_v33 = vld [vmem:[%s894_s1 + $0x8] sm:$0xf] }
  0x15   : > { %s601_s28 = sshll.u32 %s192_s27, 5  ;;  %v580_v34 = vld [vmem:[%s894_s1 + $0x18] sm:$0xf]  ;;  %v592_v40 = vld [vmem:[%s894_s1 + $0x14] sm:$0xf] }
  0x16   : > { %s800_s5 = scalar_lea.vmem %s893_s0, %s601_s28  ;;  %v585_v45 = vld [vmem:[%s894_s1 + $0x4] sm:$0xf]  ;;  %v590_v46 = vld [vmem:[%s894_s1 + $0xc] sm:$0xf]  ;;  %v587_v47 = vld [vmem:[%s894_s1 + $0x1c] sm:$0xf] }
  0x17   : > { %v197_v0 = vld [vmem:[%s800_s5] sm:$0xff]  ;;  %v589_v5 = vld [vmem:[%s800_s5 + $0x10] sm:$0xff]  ;;  %v584_v8 = vld [vmem:[%s800_s5 + $0x8] sm:$0xff] }
  0x18   : > { %v202_v1 = vunpack.c.l.b16 %v197_v0  ;;  %v203_v3 = vunpack.c.h.b16 %v197_v0  ;;  %v392_v6 = vunpack.c.h.b16 %v589_v5  ;;  %v391_v7 = vunpack.c.l.b16 %v589_v5  ;;  %v594_v30 = vld [vmem:[%s800_s5 + $0x18] sm:$0xff]  ;;  %v595_v48 = vld [vmem:[%s894_s1 + $0x10] sm:$0xf]  ;;  %s508_s5 = sshll.u32 %s190_s30, 4  ;;  %s509_s5 = int_to_ptr.vmem [resolvable:$true] %s508_s5 }
  0x19   : > { %v335_v9 = vunpack.c.l.b16 %v584_v8  ;;  %v336_v13 = vunpack.c.h.b16 %v584_v8  ;;  %v237_v16 = vsel %vm216_vm0, %v197_v0, 0  ;;  %v316_v28 = vsel %vm216_vm0, %v584_v8, 0  ;;  %v649_v8 = vld [vmem:[%s896_s3] ss:$0 sm:$0xff] }
  0x1a   : > { %v204_v2 = vpack.c.b16 %v202_v1, %v202_v1  ;;  %v205_v4 = vpack.c.b16 %v203_v3, %v203_v3  ;;  %v394_v10 = vpack.c.b16 %v392_v6, %v392_v6  ;;  %v393_v11 = vpack.c.b16 %v391_v7, %v391_v7  ;;  %246 = vmatpush.bf16.msra.mxu1 %v237_v16 }
  0x1b   : > { %v337_v12 = vpack.c.b16 %v335_v9, %v335_v9  ;;  %v338_v14 = vpack.c.b16 %v336_v13, %v336_v13  ;;  %v372_v29 = vsel %vm216_vm0, %v589_v5, 0  ;;  %v428_v35 = vsel %vm216_vm0, %v594_v30, 0 }
  0x1c   : > { %254 = vrot.lane.b32.xlu1 %v204_v2, %s716_s6  ;;  %206 = vrot.lane.b32.xlu0 %v204_v2, %s717_s7 }
  0x1d   : > { %282 = vrot.lane.b32.xlu2 %v204_v2, %s718_s8  ;;  %579 = vmatmul.msk.bf16.vlgmr.msra.gmra.mxu1 %vm212_vm1, %v198_v17  ;;  %v719_v17 = vmov 0  }
  0x1e   : > { %647 = vset.pattern.permute.xlu0 %v719_v17 }
  0x24   : > { %256 = vrot.lane.b32.xlu1 %v205_v4, %s716_s6  ;;  %208 = vrot.lane.b32.xlu0 %v205_v4, %s717_s7 }
  0x25   : > { %284 = vrot.lane.b32.xlu2 %v205_v4, %s718_s8 }
  0x2c   : > { %397 = vrot.lane.b32.xlu1 %v394_v10, %s717_s7  ;;  %395 = vrot.lane.b32.xlu0 %v393_v11, %s717_s7  ;;  %s496_s7 = scalar_lea.sflag [#allocation3], %s188_s20 }
  0x2d   : > { %339 = vrot.lane.b32.xlu2 %v337_v12, %s716_s6 }
  0x34   : > { %341 = vrot.lane.b32.xlu0 %v338_v14, %s716_s6  ;;  %s510_s6 = sshll.u32 %s506_s29, 4  ;;  %s511_s6 = int_to_ptr.hbm [resolvable:$true] %s510_s6 }
  0x35   : > { %s666_s19 = sshra.s32 %s511_s6, 4  ;;  %s667_s19 = int_to_ptr.hbm [resolvable:$true] %s666_s19 }
  0x36   : > { %s668_s8 = scalar_lea.hbm %s667_s19, 4  ;;  %p673_p0 = scmp.lt.s32.totalorder %s667_s19, %s897_s4 }
  0x37   : > { %p669_p11 = scmp.ne.s32.totalorder %s667_s19, %s668_s8  ;;  %p674_p1 = scmp.lt.s32.totalorder %s672_s11, %s668_s8 }
  0x39   : > { %p670_p12 = pnand %p669_p11, %p785_p5  ;;  %p675_p2 = por %p674_p1, %p673_p0 }
  0x3b   : > { %p671_p13 = pneg %p670_p12 }
  0x3d   : > { %p676_p3 = pnand %p675_p2, %p671_p13 }
  0x77   : > { %v283_v15 = vpop.permute.xlu2 %282 }
  0x7f   : > { %v285_v18 = vpop.permute.xlu2 %284 }
  0x80   : > { %v287_v19 = vsel %vm286_vm2, %v283_v15, %v285_v18 }
  0x81   : > { %v292_v20 = vsel %vm216_vm0, %v287_v19, 0 }
  0x82   : > { %301 = vmatpush.bf16.msra.mxu3 %v292_v20 }
  0x85   : > { %583 = vmatmul.msk.bf16.vlgmr.msra.gmra.mxu3 %vm212_vm1, %v582_v21 }
  0x87   : > { %v340_v41 = vpop.permute.xlu2 %339 }
  0x8e   : > { %v255_v22 = vpop.permute.xlu1 %254  ;;  %v207_v23 = vpop.permute.xlu0 %206 }
  0x96   : > { %v257_v24 = vpop.permute.xlu1 %256  ;;  %v209_v25 = vpop.permute.xlu0 %208 }
  0x97   : > { %v211_v26 = vsel %vm210_vm3, %v207_v23, %v209_v25  ;;  %v259_v27 = vsel %vm258_vm4, %v255_v22, %v257_v24 }
  0x98   : > { %v218_v31 = vsel %vm216_vm0, %v211_v26, 0  ;;  %v264_v32 = vsel %vm216_vm0, %v259_v27, 0 }
  0x99   : > { %227 = vmatpush.bf16.msra.mxu0 %v218_v31  ;;  %273 = vmatpush.bf16.msra.mxu2 %v264_v32 }
  0x9a   : > { %v248_v49 = vpop.f32.mrf.mxu1 }
  0x9c   : > { %578 = vmatmul.msk.bf16.vlgmr.msra.gmra.mxu0 %vm212_vm1, %v577_v33  ;;  %581 = vmatmul.msk.bf16.vlgmr.msra.gmra.mxu2 %vm212_vm1, %v580_v34  ;;  %v721_v33 = vmov 1  }
  0x9d   : > { %325 = vmatpush.bf16.msrb.mxu0 %v316_v28  ;;  %381 = vmatpush.bf16.msrb.mxu2 %v372_v29  ;;  %v470_v29 = vld [vmem:[%s895_s2] sm:$0xff] }
  0x9e   : > { %v398_v36 = vpop.permute.xlu1 %397  ;;  %v396_v37 = vpop.permute.xlu0 %395 }
  0x9f   : > { %v399_v38 = vsel %vm210_vm3, %v396_v37, %v398_v36 }
  0xa0   : > { %v404_v39 = vsel %vm216_vm0, %v399_v38, 0 }
  0xa1   : > { %437 = vmatpush.bf16.msra.mxu0 %v428_v35  ;;  %413 = vmatpush.bf16.msrb.mxu3 %v404_v39 }
  0xa2   : > { %v250_v50 = vpop.f32.mrf.mxu1 }
  0xa4   : > { %593 = vmatmul.msk.bf16.vlgmr.msrb.gmra.mxu3 %vm212_vm1, %v592_v40 }
  0xa6   : > { %v342_v42 = vpop.permute.xlu0 %341 }
  0xa7   : > { %v343_v43 = vsel %vm258_vm4, %v340_v41, %v342_v42 }
  0xa8   : > { %v348_v44 = vsel %vm216_vm0, %v343_v43, 0 }
  0xa9   : > { %357 = vmatpush.bf16.msrb.mxu1 %v348_v44 }
  0xac   : > { %586 = vmatmul.msk.bf16.vlgmr.msrb.gmra.mxu0 %vm212_vm1, %v585_v45  ;;  %591 = vmatmul.msk.bf16.vlgmr.msrb.gmra.mxu2 %vm212_vm1, %v590_v46 }
  0xad   : > { %588 = vmatmul.msk.bf16.vlgmr.msrb.gmra.mxu1 %vm212_vm1, %v587_v47 }
  0xbc   : > { %596 = vmatmul.msk.bf16.vlgmr.msra.gmra.mxu0 %vm212_vm1, %v595_v48 }
 0x108   : > { %v303_v51 = vpop.f32.mrf.mxu3 }
 0x110   : > { %v305_v52 = vpop.f32.mrf.mxu3 }
 0x119   : > { %v229_v53 = vpop.f32.mrf.mxu0 }
 0x11a   : > { %v249_v56 = vadd.f32 %v248_v49, %v229_v53 }
 0x11f   : > { %v275_v54 = vpop.f32.mrf.mxu2 }
 0x120   : > { %v279_v59 = vadd.f32 %v275_v54, %v249_v56 }
 0x121   : > { %v231_v55 = vpop.f32.mrf.mxu0 }
 0x122   : > { %v307_v62 = vadd.f32 %v303_v51, %v279_v59 }
 0x127   : > { %v277_v57 = vpop.f32.mrf.mxu2  ;;  %v415_v58 = vpop.f32.mrf.mxu3 }
 0x129   : > { %v327_v60 = vpop.f32.mrf.mxu0 }
 0x12a   : > { %v359_v61 = vpop.f32.mrf.mxu1  ;;  %v331_v63 = vadd.f32 %v327_v60, %v307_v62 }
 0x12c   : > { %v363_v3 = vadd.f32 %v359_v61, %v331_v63 }
 0x12f   : > { %v383_v0 = vpop.f32.mrf.mxu2  ;;  %v417_v1 = vpop.f32.mrf.mxu3 }
 0x130   : > { %v387_v5 = vadd.f32 %v383_v0, %v363_v3 }
 0x131   : > { %v329_v2 = vpop.f32.mrf.mxu0 }
 0x132   : > { %v361_v4 = vpop.f32.mrf.mxu1  ;;  %v419_v7 = vadd.f32 %v415_v58, %v387_v5 }
 0x137   : > { %v385_v6 = vpop.f32.mrf.mxu2 }
 0x139   : > { %v439_v9 = vpop.f32.mrf.mxu0 }
 0x13a   : > { %v443_v10 = vadd.f32 %v439_v9, %v419_v7 }
 0x13c   : > { %v448_v11 = vmul.f32 %v649_v8, %v443_v10 }
 0x13e   : > { %449 = vadd.xlane.f32.xlu1 %v448_v11  ;;  %v451_v12 = vmul.f32 %v448_v11, %v448_v11 }
 0x140   : > { %452 = vadd.xlane.f32.xlu2 %v451_v12 }
 0x141   : > { %v441_v13 = vpop.f32.mrf.mxu0 }
 0x1b1   : > { %v450_v14 = vpop.xlane.xlu1 %449 }
 0x1b2   : > { %v454_v15 = vmul.f32 0.020408163, %v450_v14 }
 0x1b3   : > { %v453_v16 = vpop.xlane.xlu2 %452 }
 0x1b4   : > { %v456_v18 = vmul.f32 %v454_v15, %v454_v15  ;;  %v455_v19 = vmul.f32 0.020408163, %v453_v16 }
 0x1b6   : > { %v457_v20 = vsub.f32 %v455_v19, %v456_v18 }
 0x1b8   : > { %v458_v21 = vmax.f32 %v457_v20, 0.0 }
 0x1ba   : > { %v459_v22 = vadd.f32 1e-05, %v458_v21 }
 0x1bc   : > { %650 = vrsqrt.f32 %v459_v22  ;;  %vm466_vm6 = vweird.f32 %v459_v22 }
 0x1c2   : > { %v651_v23 = vpop.eup %650 }
 0x1c3   : > { %v461_v24 = vmul.f32 %v651_v23, %v459_v22  ;;  %vm467_vm5 = vweird.f32 %v651_v23 }
 0x1c4   : > { %vm468_vm7 = vmor %vm466_vm6, %vm467_vm5 }
 0x1c5   : > { %v462_v25 = vmul.f32 %v651_v23, %v461_v24 }
 0x1c7   : > { %v463_v26 = vmul.f32 0.5, %v462_v25 }
 0x1c9   : > { %v464_v27 = vsub.f32 1.5, %v463_v26 }
 0x1cb   : > { %v465_v28 = vmul.f32 %v651_v23, %v464_v27 }
 0x1cd   : > { %v469_v30 = vsel %vm468_vm7, %v651_v23, %v465_v28 }
 0x1ce   : > { %v471_v31 = vmul.f32 %v470_v29, %v469_v30 }
 0x1d0   : > { %v472_v32 = vmul.f32 %v471_v31, %v454_v15 }
 0x1d2   : > { %474 = vrot.lane.b32.xlu0 %v472_v32, %s720_s14 }
 0x1da   : > { %480 = vperm.xlu0 %647, %v471_v31  }
 0x1e2   : > { %648 = vset.pattern.permute.xlu0 %v721_v33 }
 0x244   : > { %v475_v34 = vpop.permute.xlu0 %474 }
 0x245   : > { %v477_v35 = vsub.f32 %v470_v29, %v475_v34 }
 0x247   : > { %486 = vperm.xlu0 %648, %v477_v35  }
 0x24c   : > { %v481_v36 = vpop.permute.xlu0 %480 }
 0x24d   : > { %v483_v37 = vmul.f32 %v481_v36, %v443_v10 }
 0x2b9   : > { %v487_v38 = vpop.permute.xlu0 %486 }
 0x2ba   : > { %v489_v39 = vadd.f32 %v487_v38, %v483_v37 }
 0x2bc   : > { %vm490_vm8 = vcmp.ge.f32.partialorder %v489_v39, 0.0  ;;  %v491_v40 = vmul.f32 0.3, %v489_v39 }
 0x2be   : > { %v492_v41 = vsel %vm490_vm8, %v489_v39, %v491_v40 }
 0x2bf   : > { %v493_v42 = vpack.c.bf16 %v492_v41, %v492_v41 }
 0x2c1   : > { %494 = vst [vmem:[%s190_s30] sm:$0xf] %v493_v42 }
 0x2c2   : > { %679 = shalt.err (!%p676_p3)
}
 0x2c3   : > { %602 = dma.vmem_to_hbm [thread:$0]  (%p785_p5), %s509_s5, 64, %s511_s6, %s496_s7  }
 0x2c4 PF: > { %p608_p4 = scmp.ge.s32.totalorder %s714_s18, 2  ;;  %s522_s14 = sand.u32 1, %s702_s15  }
 0x2c5   : > { %s523_s20 = scalar_lea.sflag [#allocation3], %s522_s14 }
 0x2c6   : > { %p605_p7 = pnand %p608_p4, %p789_p6 }
 0x2c8   : > { %p606_p8 = pneg %p605_p7 }
 0x2ca   : > { %697 = dma.done.wait (%p606_p8), %s523_s20, 64  }
 0x2cb   : > { %699 = vsyncadd (%p606_p8), %s523_s20, 4294967232  ;;  %p14_p9 = scmp.ge.s32.totalorder %s772_s21, 4   ;;  %s900_s15 = smov %s706_s16 }
 0x2cc   : > { %s901_s16 = smov %s710_s17  ;;  %s902_s17 = smov %s783_s24 }
 0x2cd   : > { %s903_s18 = smov %s772_s21  ;;  %16 = sbr.rel (!%p14_p9) target bundleno = 3 (0x3), region = 82 }
 0x2d2   :  { %529 = vsyncpa [#allocation3], 1 }
 0x2d3   :  { %531 = vsyncpa [#allocation3 + $0x1], 1 }

</bundles_post_ra>
